<compile_context>
chip_gen: v5e
topology: v5e:2x2
jax: 0.10.0
libtpu: 0.0.40
codegen_flags: <defaults>
</compile_context>

<pallas_src>
import functools

import jax
import jax.numpy as jnp
from jax.experimental import pallas as pl
from jax.experimental.pallas import tpu as pltpu


def residual_kernel(x_ref, w1_ref, w2_ref, o_ref, apad_ref, stack_ref, *,
                    H, W, Cin):
    # x_ref    : (Cin,  BLK)   BLK = (batch-per-block)*H*W, lanes = [b, h, w]
    # w1_ref   : (Ch,   9*CP)  3x3 weight, tap-major, each tap zero-padded Cin->CP
    # w2_ref   : (Cout, Ch)    1x1 weight
    # o_ref    : (Cout, BLK)
    # apad_ref : (CP,   BLK)   VMEM scratch: ReLU(x) zero-padded to CP sublanes
    # stack_ref: (9*CP, BLK)   VMEM scratch: im2col tap stack
    CP, BLK = apad_ref.shape
    HW = H * W

    x = x_ref[...].astype(jnp.float32)            # pre-ReLU input == skip branch

    # Pad ReLU(x) to CP sublanes (pad rows stay zero and hit zero weight cols).
    apad_ref[...] = jnp.zeros_like(apad_ref)
    apad_ref[pl.ds(0, Cin), :] = jnp.maximum(x, 0.0)
    a = apad_ref[...]                             # (CP, BLK), tile-shaped

    # Per-lane spatial coordinates inside each HxW image (lane % HW keeps the
    # batch fold correct).  Hoisted once; shifts/ANDs for power-of-two sizes.
    pos = jax.lax.broadcasted_iota(jnp.int32, (CP, BLK), 1)
    if (HW & (HW - 1)) == 0 and (W & (W - 1)) == 0:
        p_img = pos & (HW - 1)
        col = p_img & (W - 1)
        row = p_img >> (W.bit_length() - 1)
    else:
        p_img = pos % HW
        row = p_img // W
        col = p_img - row * W
    not_top = row >= 1
    not_bot = row < (H - 1)
    not_left = col >= 1
    not_right = col < (W - 1)

    # im2col: one aligned 8-sublane store per tap into the stack scratch.
    for dh in (-1, 0, 1):
        for dw in (-1, 0, 1):
            t = (dh + 1) * 3 + (dw + 1)           # tap index (kh*3 + kw)
            s = dh * W + dw                       # flat lane offset of the tap
            # shifted[p] = a[(p + s) mod BLK]  (roll by -s, np.roll semantics)
            shifted = a if s == 0 else pltpu.roll(a, shift=(-s) % BLK, axis=1)
            valid = None
            if dh == -1:
                valid = not_top
            elif dh == 1:
                valid = not_bot
            if dw == -1:
                valid = not_left if valid is None else (valid & not_left)
            elif dw == 1:
                valid = not_right if valid is None else (valid & not_right)
            tap = shifted if valid is None else jnp.where(valid, shifted, 0.0)
            stack_ref[pl.ds(t * CP, CP), :] = tap

    # Fused 3x3 conv: ONE MXU matmul over K = 9*CP, then ReLU.
    hidden = jnp.maximum(
        jnp.dot(w1_ref[...].astype(jnp.float32), stack_ref[...],
                preferred_element_type=jnp.float32),
        0.0)
    # 1x1 conv == matmul, then the residual skip add.
    y = jnp.dot(w2_ref[...].astype(jnp.float32), hidden,
                preferred_element_type=jnp.float32)
    o_ref[...] = (x + y).astype(o_ref.dtype)


def _default_num_blocks(n_batch):
    """1 fused grid step on single-TC chips (v5e/v6e); 2 on v7x (one per TC)."""
    try:
        kind = jax.devices()[0].device_kind.lower()
    except Exception:
        return 1
    if n_batch % 2 == 0 and ("v7" in kind or "tpu7" in kind):
        return 2
    return 1


def residual_forward(x_nchw, w1, w2, *, num_blocks=None):
    """x_nchw: (N, Cin, H, W); w1: (Ch, Cin, 3, 3); w2: (Cout, Ch, 1, 1)."""
    N, Cin, H, W = x_nchw.shape
    Ch = w1.shape[0]
    Cout = w2.shape[0]
    HW = H * W
    CP = ((Cin + 7) // 8) * 8                 # pad each tap's Cin to 8 sublanes

    if num_blocks is None:
        num_blocks = _default_num_blocks(N)
    if num_blocks > 1:
        ok = (N % num_blocks == 0) and (((N // num_blocks) * HW) % 128 == 0)
        if not ok:
            num_blocks = 1
    BLK = (N // num_blocks) * HW

    # Fold batch onto the lane axis: (N, Cin, HW) -> (Cin, N*HW).  Pure layout
    # plumbing (tiny): gives the MXU an N*HW-wide N-dimension and lets
    # v5e/v6e run a single grid step.
    x2 = jnp.transpose(x_nchw.reshape(N, Cin, HW), (1, 0, 2)).reshape(Cin, N * HW)

    # w1 (Ch, Cin, 3, 3) -> tap-major, Cin zero-padded to CP -> (Ch, 9*CP):
    # final MXU-LHS layout, one clean weight tile (tap t = kh*3 + kw).
    w1_taps = jnp.transpose(w1, (2, 3, 0, 1)).reshape(9, Ch, Cin)
    w1_taps = jnp.pad(w1_taps, ((0, 0), (0, 0), (0, CP - Cin)))
    w1k = jnp.transpose(w1_taps, (1, 0, 2)).reshape(Ch, 9 * CP)
    w2k = w2[:, :, 0, 0]

    kernel = functools.partial(residual_kernel, H=H, W=W, Cin=Cin)

    out = pl.pallas_call(
        kernel,
        out_shape=jax.ShapeDtypeStruct((Cout, N * HW), x_nchw.dtype),
        grid_spec=pltpu.PrefetchScalarGridSpec(
            num_scalar_prefetch=0,
            grid=(num_blocks,),
            in_specs=[
                pl.BlockSpec((Cin, BLK), lambda b: (0, b)),
                pl.BlockSpec((Ch, 9 * CP), lambda b: (0, 0)),
                pl.BlockSpec((Cout, Ch), lambda b: (0, 0)),
            ],
            out_specs=pl.BlockSpec((Cout, BLK), lambda b: (0, b)),
            scratch_shapes=[
                pltpu.VMEM((CP, BLK), jnp.float32),
                pltpu.VMEM((9 * CP, BLK), jnp.float32),
            ],
        ),
        compiler_params=pltpu.CompilerParams(
            dimension_semantics=("parallel",),
            vmem_limit_bytes=32 * 1024 * 1024,   # explicit; safe on v5e/v6e/v7x
        ),
    )(x2, w1k, w2k)

    # Undo the fold: (Cout, N*HW) -> (N, Cout, H, W).
    return jnp.transpose(out.reshape(Cout, N, HW), (1, 0, 2)).reshape(N, Cout, H, W)


def residual_ref(x, w1, w2):
    """Pure-JAX reference matching the PyTorch module exactly (NCHW)."""
    a = jax.nn.relu(x)
    h = jax.lax.conv_general_dilated(
        a, w1, window_strides=(1, 1), padding=((1, 1), (1, 1)),
        dimension_numbers=("NCHW", "OIHW", "NCHW"))
    h = jax.nn.relu(h)
    y = jax.lax.conv_general_dilated(
        h, w2, window_strides=(1, 1), padding="VALID",
        dimension_numbers=("NCHW", "OIHW", "NCHW"))
    return x + y


if __name__ == "__main__":
    # Residual requires num_hiddens == in_channels for the skip add.
    N, in_channels, H, W = 2, 4, 16, 16
    num_hiddens = in_channels
    num_residual_hiddens = 8

    key = jax.random.PRNGKey(0)
    kx, kw1, kw2 = jax.random.split(key, 3)

    x = jax.random.normal(kx, (N, in_channels, H, W), dtype=jnp.float32)
    # Deterministic synthetic weights (kaiming-ish scaling), PyTorch OIHW layout.
    w1 = jax.random.normal(
        kw1, (num_residual_hiddens, in_channels, 3, 3), dtype=jnp.float32
    ) * (2.0 / (in_channels * 9)) ** 0.5
    w2 = jax.random.normal(
        kw2, (num_hiddens, num_residual_hiddens, 1, 1), dtype=jnp.float32
    ) * (2.0 / num_residual_hiddens) ** 0.5

    out = residual_forward(x, w1, w2)
    out = jax.block_until_ready(out)

    ref = residual_ref(x, w1, w2)
    assert out.shape == ref.shape and out.dtype == ref.dtype
    assert jnp.allclose(out, ref, atol=1e-4, rtol=1e-4), "mismatch vs reference"

    print("KERNEL_OK")
</pallas_src>

<mosaic_0001>
module attributes {stable_mosaic.version = 11 : i64} {
  func.func @residual_kernel(%arg0: i32, %arg1: memref<4x512xf32, #tpu.memory_space<vmem>>, %arg2: memref<8x72xf32, #tpu.memory_space<vmem>>, %arg3: memref<4x8xf32, #tpu.memory_space<vmem>>, %arg4: memref<4x512xf32, #tpu.memory_space<vmem>>, %arg5: memref<8x512xf32, #tpu.memory_space<vmem>>, %arg6: memref<72x512xf32, #tpu.memory_space<vmem>>) attributes {dimension_semantics = [#tpu.dimension_semantics<parallel>], iteration_bounds = array<i64: 1>, scalar_prefetch = 0 : i64, scratch_operands = 2 : i64, tpu.core_type = #tpu.core_type<tc>, window_params = [{transform_indices = @transform_0, window_bounds = array<i64: 4, 512>}, {pipeline_mode = #tpu.pipeline_mode<synchronous>, transform_indices = @transform_1, window_bounds = array<i64: 8, 72>}, {pipeline_mode = #tpu.pipeline_mode<synchronous>, transform_indices = @transform_2, window_bounds = array<i64: 4, 8>}, {transform_indices = @transform_3, window_bounds = array<i64: 4, 512>}]} {
    %c0 = arith.constant 0 : index
    %c0_0 = arith.constant 0 : index
    %0 = vector.load %arg1[%c0, %c0_0] : memref<4x512xf32, #tpu.memory_space<vmem>>, vector<4x512xf32>
    %cst = arith.constant 0.000000e+00 : f32
    %1 = vector.broadcast %cst : f32 to vector<8x512xf32>
    %c0_1 = arith.constant 0 : index
    %c0_2 = arith.constant 0 : index
    %2 = vector.load %arg5[%c0_1, %c0_2] : memref<8x512xf32, #tpu.memory_space<vmem>>, vector<8x512xf32>
    tpu.vector_store %arg5[%c0_1, %c0_2], %1 {strides = array<i32>} : memref<8x512xf32, #tpu.memory_space<vmem>>, vector<8x512xf32>,
    %cst_3 = arith.constant 0.000000e+00 : f32
    %3 = vector.broadcast %cst_3 : f32 to vector<4x512xf32>
    %4 = arith.maximumf %0, %3 : vector<4x512xf32>
    %c0_4 = arith.constant 0 : index
    %c0_5 = arith.constant 0 : index
    %5 = vector.load %arg5[%c0_4, %c0_5] : memref<8x512xf32, #tpu.memory_space<vmem>>, vector<4x512xf32>
    tpu.vector_store %arg5[%c0_4, %c0_5], %4 {strides = array<i32>} : memref<8x512xf32, #tpu.memory_space<vmem>>, vector<4x512xf32>,
    %c0_6 = arith.constant 0 : index
    %c0_7 = arith.constant 0 : index
    %6 = vector.load %arg5[%c0_6, %c0_7] : memref<8x512xf32, #tpu.memory_space<vmem>>, vector<8x512xf32>
    %7 = tpu.iota {dimensions = array<i32: 1>} : vector<8x512xi32>
    %c255_i32 = arith.constant 255 : i32
    %8 = vector.broadcast %c255_i32 : i32 to vector<8x512xi32>
    %9 = arith.andi %7, %8 : vector<8x512xi32>
    %c15_i32 = arith.constant 15 : i32
    %10 = vector.broadcast %c15_i32 : i32 to vector<8x512xi32>
    %11 = arith.andi %9, %10 : vector<8x512xi32>
    %c4_i32 = arith.constant 4 : i32
    %12 = vector.broadcast %c4_i32 : i32 to vector<8x512xi32>
    %13 = arith.shrsi %9, %12 : vector<8x512xi32>
    %c1_i32 = arith.constant 1 : i32
    %14 = vector.broadcast %c1_i32 : i32 to vector<8x512xi32>
    %15 = arith.cmpi sge, %13, %14 : vector<8x512xi32>
    %c15_i32_8 = arith.constant 15 : i32
    %16 = vector.broadcast %c15_i32_8 : i32 to vector<8x512xi32>
    %17 = arith.cmpi slt, %13, %16 : vector<8x512xi32>
    %c1_i32_9 = arith.constant 1 : i32
    %18 = vector.broadcast %c1_i32_9 : i32 to vector<8x512xi32>
    %19 = arith.cmpi sge, %11, %18 : vector<8x512xi32>
    %c15_i32_10 = arith.constant 15 : i32
    %20 = vector.broadcast %c15_i32_10 : i32 to vector<8x512xi32>
    %21 = arith.cmpi slt, %11, %20 : vector<8x512xi32>
    %c17_i32 = arith.constant 17 : i32
    %22 = tpu.dynamic_rotate %6 by %c17_i32 dim 1 : vector<8x512xf32>, i32 -> vector<8x512xf32>
    %23 = arith.andi %15, %19 : vector<8x512xi1>
    %cst_11 = arith.constant 0.000000e+00 : f32
    %24 = vector.broadcast %cst_11 : f32 to vector<8x512xf32>
    %25 = arith.select %23, %22, %24 : vector<8x512xi1>, vector<8x512xf32>
    %c0_12 = arith.constant 0 : index
    %c0_13 = arith.constant 0 : index
    %26 = vector.load %arg6[%c0_12, %c0_13] : memref<72x512xf32, #tpu.memory_space<vmem>>, vector<8x512xf32>
    tpu.vector_store %arg6[%c0_12, %c0_13], %25 {strides = array<i32>} : memref<72x512xf32, #tpu.memory_space<vmem>>, vector<8x512xf32>,
    %c16_i32 = arith.constant 16 : i32
    %27 = tpu.dynamic_rotate %6 by %c16_i32 dim 1 : vector<8x512xf32>, i32 -> vector<8x512xf32>
    %cst_14 = arith.constant 0.000000e+00 : f32
    %28 = vector.broadcast %cst_14 : f32 to vector<8x512xf32>
    %29 = arith.select %15, %27, %28 : vector<8x512xi1>, vector<8x512xf32>
    %c8 = arith.constant 8 : index
    %c0_15 = arith.constant 0 : index
    %30 = vector.load %arg6[%c8, %c0_15] : memref<72x512xf32, #tpu.memory_space<vmem>>, vector<8x512xf32>
    tpu.vector_store %arg6[%c8, %c0_15], %29 {strides = array<i32>} : memref<72x512xf32, #tpu.memory_space<vmem>>, vector<8x512xf32>,
    %c15_i32_16 = arith.constant 15 : i32
    %31 = tpu.dynamic_rotate %6 by %c15_i32_16 dim 1 : vector<8x512xf32>, i32 -> vector<8x512xf32>
    %32 = arith.andi %15, %21 : vector<8x512xi1>
    %cst_17 = arith.constant 0.000000e+00 : f32
    %33 = vector.broadcast %cst_17 : f32 to vector<8x512xf32>
    %34 = arith.select %32, %31, %33 : vector<8x512xi1>, vector<8x512xf32>
    %c16 = arith.constant 16 : index
    %c0_18 = arith.constant 0 : index
    %35 = vector.load %arg6[%c16, %c0_18] : memref<72x512xf32, #tpu.memory_space<vmem>>, vector<8x512xf32>
    tpu.vector_store %arg6[%c16, %c0_18], %34 {strides = array<i32>} : memref<72x512xf32, #tpu.memory_space<vmem>>, vector<8x512xf32>,
    %c1_i32_19 = arith.constant 1 : i32
    %36 = tpu.dynamic_rotate %6 by %c1_i32_19 dim 1 : vector<8x512xf32>, i32 -> vector<8x512xf32>
    %cst_20 = arith.constant 0.000000e+00 : f32
    %37 = vector.broadcast %cst_20 : f32 to vector<8x512xf32>
    %38 = arith.select %19, %36, %37 : vector<8x512xi1>, vector<8x512xf32>
    %c24 = arith.constant 24 : index
    %c0_21 = arith.constant 0 : index
    %39 = vector.load %arg6[%c24, %c0_21] : memref<72x512xf32, #tpu.memory_space<vmem>>, vector<8x512xf32>
    tpu.vector_store %arg6[%c24, %c0_21], %38 {strides = array<i32>} : memref<72x512xf32, #tpu.memory_space<vmem>>, vector<8x512xf32>,
    %c32 = arith.constant 32 : index
    %c0_22 = arith.constant 0 : index
    %40 = vector.load %arg6[%c32, %c0_22] : memref<72x512xf32, #tpu.memory_space<vmem>>, vector<8x512xf32>
    tpu.vector_store %arg6[%c32, %c0_22], %6 {strides = array<i32>} : memref<72x512xf32, #tpu.memory_space<vmem>>, vector<8x512xf32>,
    %c511_i32 = arith.constant 511 : i32
    %41 = tpu.dynamic_rotate %6 by %c511_i32 dim 1 : vector<8x512xf32>, i32 -> vector<8x512xf32>
    %cst_23 = arith.constant 0.000000e+00 : f32
    %42 = vector.broadcast %cst_23 : f32 to vector<8x512xf32>
    %43 = arith.select %21, %41, %42 : vector<8x512xi1>, vector<8x512xf32>
    %c40 = arith.constant 40 : index
    %c0_24 = arith.constant 0 : index
    %44 = vector.load %arg6[%c40, %c0_24] : memref<72x512xf32, #tpu.memory_space<vmem>>, vector<8x512xf32>
    tpu.vector_store %arg6[%c40, %c0_24], %43 {strides = array<i32>} : memref<72x512xf32, #tpu.memory_space<vmem>>, vector<8x512xf32>,
    %c497_i32 = arith.constant 497 : i32
    %45 = tpu.dynamic_rotate %6 by %c497_i32 dim 1 : vector<8x512xf32>, i32 -> vector<8x512xf32>
    %46 = arith.andi %17, %19 : vector<8x512xi1>
    %cst_25 = arith.constant 0.000000e+00 : f32
    %47 = vector.broadcast %cst_25 : f32 to vector<8x512xf32>
    %48 = arith.select %46, %45, %47 : vector<8x512xi1>, vector<8x512xf32>
    %c48 = arith.constant 48 : index
    %c0_26 = arith.constant 0 : index
    %49 = vector.load %arg6[%c48, %c0_26] : memref<72x512xf32, #tpu.memory_space<vmem>>, vector<8x512xf32>
    tpu.vector_store %arg6[%c48, %c0_26], %48 {strides = array<i32>} : memref<72x512xf32, #tpu.memory_space<vmem>>, vector<8x512xf32>,
    %c496_i32 = arith.constant 496 : i32
    %50 = tpu.dynamic_rotate %6 by %c496_i32 dim 1 : vector<8x512xf32>, i32 -> vector<8x512xf32>
    %cst_27 = arith.constant 0.000000e+00 : f32
    %51 = vector.broadcast %cst_27 : f32 to vector<8x512xf32>
    %52 = arith.select %17, %50, %51 : vector<8x512xi1>, vector<8x512xf32>
    %c56 = arith.constant 56 : index
    %c0_28 = arith.constant 0 : index
    %53 = vector.load %arg6[%c56, %c0_28] : memref<72x512xf32, #tpu.memory_space<vmem>>, vector<8x512xf32>
    tpu.vector_store %arg6[%c56, %c0_28], %52 {strides = array<i32>} : memref<72x512xf32, #tpu.memory_space<vmem>>, vector<8x512xf32>,
    %c495_i32 = arith.constant 495 : i32
    %54 = tpu.dynamic_rotate %6 by %c495_i32 dim 1 : vector<8x512xf32>, i32 -> vector<8x512xf32>
    %55 = arith.andi %17, %21 : vector<8x512xi1>
    %cst_29 = arith.constant 0.000000e+00 : f32
    %56 = vector.broadcast %cst_29 : f32 to vector<8x512xf32>
    %57 = arith.select %55, %54, %56 : vector<8x512xi1>, vector<8x512xf32>
    %c64 = arith.constant 64 : index
    %c0_30 = arith.constant 0 : index
    %58 = vector.load %arg6[%c64, %c0_30] : memref<72x512xf32, #tpu.memory_space<vmem>>, vector<8x512xf32>
    tpu.vector_store %arg6[%c64, %c0_30], %57 {strides = array<i32>} : memref<72x512xf32, #tpu.memory_space<vmem>>, vector<8x512xf32>,
    %c0_31 = arith.constant 0 : index
    %c0_32 = arith.constant 0 : index
    %59 = vector.load %arg2[%c0_31, %c0_32] : memref<8x72xf32, #tpu.memory_space<vmem>>, vector<8x72xf32>
    %c0_33 = arith.constant 0 : index
    %c0_34 = arith.constant 0 : index
    %60 = vector.load %arg6[%c0_33, %c0_34] : memref<72x512xf32, #tpu.memory_space<vmem>>, vector<72x512xf32>
    %cst_35 = arith.constant dense<0.000000e+00> : vector<8x512xf32>
    %61 = tpu.matmul %59, %60, %cst_35 {dimension_numbers = #tpu.dot_dimension_numbers<[1], [0], [0], [1], [0, 0, 1, 1], [], []>} : vector<8x72xf32>, vector<72x512xf32>, vector<8x512xf32> -> vector<8x512xf32>
    %cst_36 = arith.constant 0.000000e+00 : f32
    %62 = vector.broadcast %cst_36 : f32 to vector<8x512xf32>
    %63 = arith.maximumf %61, %62 : vector<8x512xf32>
    %c0_37 = arith.constant 0 : index
    %c0_38 = arith.constant 0 : index
    %64 = vector.load %arg3[%c0_37, %c0_38] : memref<4x8xf32, #tpu.memory_space<vmem>>, vector<4x8xf32>
    %cst_39 = arith.constant dense<0.000000e+00> : vector<4x512xf32>
    %65 = tpu.matmul %64, %63, %cst_39 {dimension_numbers = #tpu.dot_dimension_numbers<[1], [0], [0], [1], [0, 0, 1, 1], [], []>} : vector<4x8xf32>, vector<8x512xf32>, vector<4x512xf32> -> vector<4x512xf32>
    %66 = arith.addf %0, %65 : vector<4x512xf32>
    %c0_40 = arith.constant 0 : index
    %c0_41 = arith.constant 0 : index
    %67 = vector.load %arg4[%c0_40, %c0_41] : memref<4x512xf32, #tpu.memory_space<vmem>>, vector<4x512xf32>
    tpu.vector_store %arg4[%c0_40, %c0_41], %66 {strides = array<i32>} : memref<4x512xf32, #tpu.memory_space<vmem>>, vector<4x512xf32>,
    return
  }
  func.func @transform_0(%arg0: i32) -> (i32, i32) {
    %c0_i32 = arith.constant 0 : i32
    %c0_i32_0 = arith.constant 0 : i32
    return %c0_i32, %arg0 : i32, i32
  }
  func.func @transform_1(%arg0: i32) -> (i32, i32) {
    %c0_i32 = arith.constant 0 : i32
    %c0_i32_0 = arith.constant 0 : i32
    %c0_i32_1 = arith.constant 0 : i32
    return %c0_i32, %c0_i32_0 : i32, i32
  }
  func.func @transform_2(%arg0: i32) -> (i32, i32) {
    %c0_i32 = arith.constant 0 : i32
    %c0_i32_0 = arith.constant 0 : i32
    %c0_i32_1 = arith.constant 0 : i32
    return %c0_i32, %c0_i32_0 : i32, i32
  }
  func.func @transform_3(%arg0: i32) -> (i32, i32) {
    %c0_i32 = arith.constant 0 : i32
    %c0_i32_0 = arith.constant 0 : i32
    return %c0_i32, %arg0 : i32, i32
  }
}

</mosaic_0001>

<bundles_post_ra>
// kernel: tpu_custom_call.1
= control target key start
LH: loop header
LB: loop body
LE: loop exit
PB: predicated region body
PF: predicated region fallthrough
CT: control target
= control target key end

     0   :  { %8 = vsyncpa [#allocation5], 0  ;;  %s1043_s0 = inlined_call_operand.hbm [shape: f32[4,512], index: 0, kind: input, shape index: {}]   ;;  %s1044_s1 = inlined_call_operand.hbm [shape: f32[8,72], index: 1, kind: input, shape index: {}]   ;;  %s1045_s2 = inlined_call_operand.hbm [shape: f32[4,8], index: 2, kind: input, shape index: {}]   ;;  %s1046_s3 = inlined_call_operand.hbm [shape: f32[4,512], index: 3, kind: output, shape index: {}]  }
   0x1   :  { %9 = vsyncpa [#allocation8], 0  ;;  %s27_s14 = sshll.u32 %s1044_s1, 4  ;;  %s28_s14 = int_to_ptr.hbm [resolvable:$true] %s27_s14 }
   0x2   :  { %10 = vsyncpa [#allocation6], 0  ;;  %s704_s15 = smov [#allocation7]   ;;  %s16_s19 = sshll.u32 %s1043_s0, 4  ;;  %s17_s19 = int_to_ptr.hbm [resolvable:$true] %s16_s19 }
   0x3   :  { %s29_s16 = sshll.u32 %s704_s15, 4  ;;  %s705_s20 = smov [#allocation4]   ;;  %s30_s16 = int_to_ptr.vmem [resolvable:$true] %s29_s16 }
   0x4   :  { %32 = dma.hbm_to_vmem [thread:$0]  %s28_s14, 128, %s30_s16, [#allocation8]  }
   0x5   :  { %s18_s21 = sshll.u32 %s705_s20, 4  ;;  %s38_s24 = sshll.u32 %s1045_s2, 4  ;;  %s19_s21 = int_to_ptr.vmem [resolvable:$true] %s18_s21  ;;  %s39_s24 = int_to_ptr.hbm [resolvable:$true] %s38_s24 }
   0x6   :  { %21 = dma.hbm_to_vmem [thread:$0]  %s17_s19, 256, %s19_s21, [#allocation5]  }
   0x7   :  { %s706_s1 = smov [#allocation9]  }
   0x8   :  { %s40_s25 = sshll.u32 %s706_s1, 4  ;;  %s41_s25 = int_to_ptr.vmem [resolvable:$true] %s40_s25 }
   0x9   :  { %43 = dma.hbm_to_vmem [thread:$0]  %s39_s24, 64, %s41_s25, [#allocation8]  }
   0xa   :  { %698 = dma.done.wait [#allocation5], 256  }
   0xb   :  { %699 = vsyncadd [#allocation5], 4294967040 }
   0xc   :  { %700 = dma.done.wait [#allocation8], 192  }
   0xd   :  { %701 = vsyncadd [#allocation8], 4294967104  ;;  %v707_v0 = vmov 0.0   ;;  %v746_v1 = vld [vmem:[#allocation4 + $0x8] sm:$0xff]  ;;  %v748_v2 = vld [vmem:[#allocation4] sm:$0xff]  ;;  %s708_s0 = smov 111   ;;  %v85_v15 = vlaneseq }
   0xe   :  { %60 = vst [vmem:[#allocation2 + $0x18] sm:$0xff] %v707_v0  ;;  %v63_v3 = vmax.f32 %v746_v1, 0.0  ;;  %v62_v4 = vmax.f32 %v748_v2, 0.0  ;;  %s709_s2 = smov 112   ;;  %s710_s26 = smov 113  }
   0xf   :  { %58 = vst [vmem:[#allocation2 + $0x10] sm:$0xff] %v707_v0  ;;  %s711_s27 = smov 127   ;;  %s712_s28 = smov 15   ;;  %v798_v16 = vand.u32 127, %v85_v15 }
  0x10   :  { %59 = vst [vmem:[#allocation2] sm:$0xff] %v707_v0  ;;  %s713_s29 = smov 1   ;;  %s714_s30 = smov 16  }
  0x11   :  { %61 = vst [vmem:[#allocation2 + $0x8] sm:$0xff] %v707_v0  ;;  %s715_s4 = smov 17   ;;  %v88_v18 = vadd.s32 256, %v798_v16  ;;  %v89_v19 = vadd.s32 384, %v798_v16  ;;  %v87_v25 = vadd.s32 128, %v798_v16  ;;  %v90_v30 = vand.u32 255, %v798_v16 }
  0x12   :  { %68 = vst [vmem:[#allocation1 + $0x10] ss:$2 sm:$0xff] %v63_v3  ;;  %vm289_vm4 = vcmp.lt.s32.totalorder %v798_v16, 111  ;;  %vm268_vm7 = vcmp.lt.s32.totalorder %v798_v16, 112  ;;  %vm243_vm15 = vcmp.lt.s32.totalorder %v798_v16, 113  ;;  %s716_s5 = smov [#allocation10]  }
  0x13   :  { %66 = vst [vmem:[#allocation1] ss:$2 sm:$0xff] %v62_v4  ;;  %v92_v20 = vand.u32 255, %v88_v18  ;;  %v93_v21 = vand.u32 255, %v89_v19  ;;  %v91_v31 = vand.u32 255, %v87_v25  ;;  %v827_v32 = vand.u32 15, %v90_v30 }
  0x14   :  { %v829_v33 = vshra.s32 %v90_v30, 4  ;;  %s536_s6 = sshll.u32 %s716_s5, 4  ;;  %s538_s9 = sshll.u32 %s1046_s3, 4  ;;  %s537_s6 = int_to_ptr.vmem [resolvable:$true] %s536_s6  ;;  %s539_s9 = int_to_ptr.hbm [resolvable:$true] %s538_s9 }
  0x15   :  { %v806_v23 = vand.u32 15, %v92_v20  ;;  %v808_v24 = vshra.s32 %v92_v20, 4  ;;  %v813_v28 = vand.u32 15, %v93_v21  ;;  %v815_v29 = vshra.s32 %v93_v21, 4 }
  0x16   :  { %v837_v35 = vand.u32 15, %v91_v31  ;;  %v839_v36 = vshra.s32 %v91_v31, 4  ;;  %vm106_vm8 = vcmp.lt.s32.totalorder %v829_v33, 15  ;;  %vm114_vm9 = vcmp.lt.s32.totalorder %v827_v32, 15 }
  0x17   :  { %vm108_vm0 = vcmp.lt.s32.totalorder %v808_v24, 15  ;;  %vm116_vm1 = vcmp.lt.s32.totalorder %v806_v23, 15  ;;  %vm109_vm2 = vcmp.lt.s32.totalorder %v815_v29, 15  ;;  %vm117_vm3 = vcmp.lt.s32.totalorder %v813_v28, 15  ;;  %vm294_vm13 = vmand %vm106_vm8, %vm114_vm9 }
  0x18   :  { %vm296_vm5 = vmand %vm108_vm0, %vm116_vm1  ;;  %vm107_vm10 = vcmp.lt.s32.totalorder %v839_v36, 15  ;;  %vm1047_vm11 = vcmp.lt.s32.totalorder %v837_v35, 15  ;;  %vm113_vm12 = vcmp.ge.s32.totalorder %v813_v28, 1 }
  0x19   :  { %v71_v5 = vld.sshfl [vmem:[#allocation1 + $0x10] sm:$0xff pattern:$0x75316420]  ;;  %v72_v6 = vld.sshfl [vmem:[#allocation1 + $0x18] sm:$0xff pattern:$0x75316420]  ;;  %vm297_vm6 = vmand %vm109_vm2, %vm117_vm3 }
  0x1a   :  { %79 = vst [vmem:[#allocation2 + $0x18] sm:$0xf] %v71_v5  ;;  %v69_v7 = vld.sshfl [vmem:[#allocation1] sm:$0xff pattern:$0x75316420]  ;;  %vm295_vm14 = vmand %vm107_vm10, %vm1047_vm11 }
  0x1b   :  { %77 = vst [vmem:[#allocation2 + $0x10] sm:$0xf] %v69_v7  ;;  %v70_v10 = vld.sshfl [vmem:[#allocation1 + $0x8] sm:$0xff pattern:$0x75316420] }
  0x1c   :  { %80 = vst [vmem:[#allocation2 + $0x8] sm:$0xf] %v72_v6 }
  0x1d   :  { %78 = vst [vmem:[#allocation2] sm:$0xf] %v70_v10 }
  0x21   :  { %v752_v8 = vld [vmem:[#allocation2 + $0x18] sm:$0xff] }
  0x22   :  { %285 = vrot.lane.b32.xlu2 %v752_v8, %s708_s0  ;;  %v755_v9 = vld [vmem:[#allocation2 + $0x10] sm:$0xff] }
  0x23   :  { %260 = vrot.lane.b32.xlu1 %v755_v9, %s709_s2  ;;  %281 = vrot.lane.b32.xlu0 %v755_v9, %s708_s0  ;;  %v760_v11 = vld [vmem:[#allocation2 + $0x8] sm:$0xff] }
  0x24   :  { %v776_v12 = vld [vmem:[#allocation2] sm:$0xff] }
  0x2a   :  { %235 = vrot.lane.b32.xlu2 %v755_v9, %s710_s26 }
  0x2b   :  { %266 = vrot.lane.b32.xlu1 %v760_v11, %s709_s2  ;;  %287 = vrot.lane.b32.xlu0 %v760_v11, %s708_s0 }
  0x32   :  { %214 = vrot.lane.b32.xlu2 %v755_v9, %s711_s27 }
  0x33   :  { %264 = vrot.lane.b32.xlu1 %v752_v8, %s709_s2  ;;  %241 = vrot.lane.b32.xlu0 %v760_v11, %s710_s26 }
  0x3a   :  { %218 = vrot.lane.b32.xlu2 %v752_v8, %s711_s27 }
  0x3b   :  { %239 = vrot.lane.b32.xlu1 %v752_v8, %s710_s26  ;;  %220 = vrot.lane.b32.xlu0 %v760_v11, %s711_s27 }
  0x42   :  { %168 = vrot.lane.b32.xlu2 %v752_v8, %s712_s28 }
  0x43   :  { %195 = vrot.lane.b32.xlu1 %v760_v11, %s713_s29  ;;  %193 = vrot.lane.b32.xlu0 %v752_v8, %s713_s29 }
  0x4a   :  { %283 = vrot.lane.b32.xlu2 %v776_v12, %s708_s0 }
  0x4b   :  { %191 = vrot.lane.b32.xlu1 %v776_v12, %s713_s29  ;;  %170 = vrot.lane.b32.xlu0 %v760_v11, %s712_s28 }
  0x52   :  { %166 = vrot.lane.b32.xlu2 %v776_v12, %s712_s28 }
  0x53   :  { %149 = vrot.lane.b32.xlu1 %v760_v11, %s714_s30  ;;  %147 = vrot.lane.b32.xlu0 %v752_v8, %s714_s30 }
  0x5a   :  { %124 = vrot.lane.b32.xlu2 %v760_v11, %s715_s4 }
  0x5b   :  { %122 = vrot.lane.b32.xlu1 %v752_v8, %s715_s4  ;;  %262 = vrot.lane.b32.xlu0 %v776_v12, %s709_s2 }
  0x62   :  { %120 = vrot.lane.b32.xlu2 %v776_v12, %s715_s4 }
  0x63   :  { %237 = vrot.lane.b32.xlu1 %v776_v12, %s710_s26  ;;  %145 = vrot.lane.b32.xlu0 %v776_v12, %s714_s30 }
  0x6a   :  { %164 = vrot.lane.b32.xlu2 %v755_v9, %s712_s28 }
  0x6b   :  { %189 = vrot.lane.b32.xlu1 %v755_v9, %s713_s29  ;;  %216 = vrot.lane.b32.xlu0 %v776_v12, %s711_s27 }
  0x73   :  { %118 = vrot.lane.b32.xlu1 %v755_v9, %s715_s4  ;;  %143 = vrot.lane.b32.xlu0 %v755_v9, %s714_s30 }
  0x7c   :  { %v286_v13 = vpop.permute.xlu2 %285 }
  0x84   :  { %v796_v14 = vpop.permute.xlu2 %235 }
  0x8c   :  { %v800_v17 = vpop.permute.xlu2 %214 }
  0x94   :  { %v804_v22 = vpop.permute.xlu2 %218 }
  0x95   :  { %v811_v26 = vpop.permute.xlu1 %260  ;;  %v282_v27 = vpop.permute.xlu0 %281 }
  0x9c   :  { %v831_v34 = vpop.permute.xlu2 %168 }
  0x9d   :  { %v267_v37 = vpop.permute.xlu1 %266  ;;  %v288_v38 = vpop.permute.xlu0 %287 }
  0x9e   :  { %v290_v39 = vsel %vm289_vm4, %v286_v13, %v288_v38  ;;  %v293_v40 = vsel %vm289_vm4, %v288_v38, %v282_v27  ;;  %v272_v41 = vsel %vm268_vm7, %v267_v37, %v811_v26  ;;  %v431_v38 = vld [vmem:[#allocation9] sm:$0xf] }
  0x9f   :  { %573 = vmatpush.msk.msra.mxu2 %vm296_vm5, %v290_v39  ;;  %581 = vmatpush.msk.msra.mxu3 %vm297_vm6, %v293_v40  ;;  %vm251_vm5 = vmand %vm109_vm2, %vm113_vm12  ;;  %vm222_vm6 = vcmp.lt.s32.totalorder %v798_v16, 127 }
  0xa1   :  { %582 = vmatpush.msk.msra.mxu3 %vm109_vm2, %v272_v41  ;;  %vm112_vm2 = vcmp.ge.s32.totalorder %v806_v23, 1 }
  0xa4   :  { %v284_v42 = vpop.permute.xlu2 %283 }
  0xa5   :  { %v265_v43 = vpop.permute.xlu1 %264  ;;  %v242_v44 = vpop.permute.xlu0 %241  ;;  %v292_v45 = vsel %vm289_vm4, %v282_v27, %v284_v42  ;;  %v291_v46 = vsel %vm289_vm4, %v284_v42, %v286_v13  ;;  %vm250_vm4 = vmand %vm108_vm0, %vm112_vm2 }
  0xa6   :  { %557 = vmatpush.msk.msra.mxu0 %vm294_vm13, %v292_v45  ;;  %565 = vmatpush.msk.msra.mxu1 %vm295_vm14, %v291_v46  ;;  %v269_v47 = vsel %vm268_vm7, %v265_v43, %v267_v37  ;;  %v247_v48 = vsel %vm243_vm15, %v242_v44, %v796_v14  ;;  %vm105_vm13 = vcmp.ge.s32.totalorder %v815_v29, 1  ;;  %vm104_vm14 = vcmp.ge.s32.totalorder %v808_v24, 1 }
  0xa7   :  { %574 = vmatpush.msk.msra.mxu2 %vm108_vm0, %v269_v47  ;;  %583 = vmatpush.msk.msra.mxu3 %vm251_vm5, %v247_v48  ;;  %vm197_vm0 = vcmp.lt.s32.totalorder %v798_v16, 1  ;;  %vm180_vm5 = vmand %vm105_vm13, %vm117_vm3 }
  0xa8   :  { %vm179_vm11 = vmand %vm104_vm14, %vm116_vm1 }
  0xac   :  { %v167_v61 = vpop.permute.xlu2 %166 }
  0xad   :  { %v240_v49 = vpop.permute.xlu1 %239  ;;  %v221_v50 = vpop.permute.xlu0 %220 }
  0xae   :  { %v244_v51 = vsel %vm243_vm15, %v240_v49, %v242_v44  ;;  %v226_v52 = vsel %vm222_vm6, %v221_v50, %v800_v17  ;;  %v223_v53 = vsel %vm222_vm6, %v804_v22, %v221_v50 }
  0xaf   :  { %575 = vmatpush.msk.msra.mxu2 %vm250_vm4, %v244_v51  ;;  %584 = vmatpush.msk.msra.mxu3 %vm117_vm3, %v226_v52  ;;  %vm1048_vm4 = vcmp.lt.s32.totalorder %v798_v16, 15  ;;  %vm151_vm3 = vcmp.lt.s32.totalorder %v798_v16, 16 }
  0xb0   :  { %v174_v62 = vsel %vm1048_vm4, %v167_v61, %v831_v34 }
  0xb1   :  { %576 = vmatpush.msk.msra.mxu2 %vm116_vm1, %v223_v53  ;;  %418 = vmatpush.msra.mxu3 %v760_v11  ;;  %vm126_vm1 = vcmp.lt.s32.totalorder %v798_v16, 17  ;;  %v306_v11 = vld [vmem:[#allocation7] sm:$0xff] }
  0xb3   :  { %398 = vmatpush.msra.mxu2 %v752_v8 }
  0xb4   :  { %v125_v4 = vpop.permute.xlu2 %124 }
  0xb5   :  { %v901_v54 = vpop.permute.xlu1 %195  ;;  %v194_v55 = vpop.permute.xlu0 %193 }
  0xb6   :  { %v198_v56 = vsel %vm197_vm0, %v194_v55, %v901_v54 }
  0xb7   :  { %585 = vmatpush.msk.msra.mxu3 %vm113_vm12, %v198_v56 }
  0xbc   :  { %v121_v21 = vpop.permute.xlu2 %120 }
  0xbd   :  { %v192_v57 = vpop.permute.xlu1 %191  ;;  %v914_v58 = vpop.permute.xlu0 %170 }
  0xbe   :  { %v199_v59 = vsel %vm197_vm0, %v192_v57, %v194_v55  ;;  %v173_v60 = vsel %vm1048_vm4, %v831_v34, %v914_v58 }
  0xbf   :  { %577 = vmatpush.msk.msra.mxu2 %vm112_vm2, %v199_v59  ;;  %586 = vmatpush.msk.msra.mxu3 %vm180_vm5, %v173_v60  ;;  %vm343_vm5 = vcmask 588800  }
  0xc1   :  { %578 = vmatpush.msk.msra.mxu2 %vm179_vm11, %v174_v62  ;;  %vm134_vm11 = vmand %vm105_vm13, %vm113_vm12  ;;  %vm110_vm12 = vcmp.ge.s32.totalorder %v827_v32, 1 }
  0xc4   :  { %v165_v24 = vpop.permute.xlu2 %164 }
  0xc5   :  { %v150_v63 = vpop.permute.xlu1 %149  ;;  %v148_v0 = vpop.permute.xlu0 %147 }
  0xc6   :  { %v152_v3 = vsel %vm151_vm3, %v148_v0, %v150_v63 }
  0xc7   :  { %587 = vmatpush.msk.msra.mxu3 %vm105_vm13, %v152_v3  ;;  %vm111_vm13 = vcmp.ge.s32.totalorder %v837_v35, 1 }
  0xc8   :  { %vm249_vm4 = vmand %vm107_vm10, %vm111_vm13 }
  0xcd   :  { %v123_v5 = vpop.permute.xlu1 %122  ;;  %v263_v6 = vpop.permute.xlu0 %262 }
  0xce   :  { %v271_v7 = vsel %vm268_vm7, %v811_v26, %v263_v6  ;;  %v270_v8 = vsel %vm268_vm7, %v263_v6, %v265_v43  ;;  %v127_v10 = vsel %vm126_vm1, %v123_v5, %v125_v4  ;;  %vm248_vm7 = vmand %vm106_vm8, %vm110_vm12 }
  0xcf   :  { %558 = vmatpush.msk.msra.mxu0 %vm106_vm8, %v271_v7  ;;  %566 = vmatpush.msk.msra.mxu1 %vm107_vm10, %v270_v8  ;;  %vm133_vm8 = vmand %vm104_vm14, %vm112_vm2  ;;  %vm102_vm10 = vcmp.ge.s32.totalorder %v829_v33, 1  ;;  %vm103_vm2 = vcmp.ge.s32.totalorder %v839_v36, 1 }
  0xd0   :  { %588 = vmatpush.msk.msra.mxu3 %vm134_vm11, %v127_v10 }
  0xd1   :  { %552 = vmatmul.msk.f32.vlgmr.msra.gmra.mxu3 %vm343_vm5, %v306_v11 }
  0xd5   :  { %v238_v13 = vpop.permute.xlu1 %237  ;;  %v146_v15 = vpop.permute.xlu0 %145 }
  0xd6   :  { %v246_v18 = vsel %vm243_vm15, %v796_v14, %v238_v13  ;;  %v245_v19 = vsel %vm243_vm15, %v238_v13, %v240_v49  ;;  %v153_v20 = vsel %vm151_vm3, %v146_v15, %v148_v0  ;;  %v128_v14 = vsel %vm126_vm1, %v121_v21, %v123_v5 }
  0xd7   :  { %559 = vmatpush.msk.msra.mxu0 %vm248_vm7, %v246_v18  ;;  %567 = vmatpush.msk.msra.mxu1 %vm249_vm4, %v245_v19  ;;  %vm1049_vm15 = vcmp.lt.s32.totalorder %v837_v35, 15  ;;  %vm132_vm7 = vmand %vm103_vm2, %vm111_vm13 }
  0xd8   :  { %579 = vmatpush.msk.msra.mxu2 %vm104_vm14, %v153_v20  ;;  %vm1050_vm14 = vmmov %vm1049_vm15 }
  0xd9   :  { %vm178_vm4 = vmand %vm103_vm2, %vm1050_vm14 }
  0xda   :  { %580 = vmatpush.msk.msra.mxu2 %vm133_vm8, %v128_v14 }
  0xdb   :  { %551 = vmatmul.msk.f32.vlgmr.msra.gmra.mxu2 %vm343_vm5, %v306_v11 }
  0xdd   :  { %v190_v25 = vpop.permute.xlu1 %189  ;;  %v217_v26 = vpop.permute.xlu0 %216 }
  0xde   :  { %v225_v27 = vsel %vm222_vm6, %v800_v17, %v217_v26  ;;  %v224_v23 = vsel %vm222_vm6, %v217_v26, %v804_v22  ;;  %vm177_vm6 = vmand %vm102_vm10, %vm114_vm9  ;;  %v201_v17 = vsel %vm197_vm0, %v901_v54, %v190_v25  ;;  %v200_v22 = vsel %vm197_vm0, %v190_v25, %v192_v57 }
  0xdf   :  { %560 = vmatpush.msk.msra.mxu0 %vm114_vm9, %v225_v27  ;;  %568 = vmatpush.msk.msra.mxu1 %vm1049_vm15, %v224_v23  ;;  %vm1051_vm9 = vcmp.lt.s32.totalorder %v798_v16, 15  ;;  %vm131_vm0 = vmand %vm102_vm10, %vm110_vm12 }
  0xe0   :  { %vm1052_vm11 = vmmov %vm1051_vm9 }
  0xe1   :  { %358 = vmatpush.msra.mxu0 %v755_v9  ;;  %378 = vmatpush.msra.mxu1 %v776_v12  ;;  %v176_v9 = vsel %vm1051_vm9, %v914_v58, %v165_v24  ;;  %v175_v12 = vsel %vm1052_vm11, %v165_v24, %v167_v61 }
  0xe3   :  { %561 = vmatpush.msk.msra.mxu0 %vm110_vm12, %v201_v17  ;;  %569 = vmatpush.msk.msra.mxu1 %vm111_vm13, %v200_v22 }
  0xe5   :  { %v119_v28 = vpop.permute.xlu1 %118  ;;  %562 = vmatpush.msk.msra.mxu0 %vm177_vm6, %v176_v9  ;;  %570 = vmatpush.msk.msra.mxu1 %vm178_vm4, %v175_v12  ;;  %v144_v29 = vpop.permute.xlu0 %143 }
  0xe6   :  { %v155_v30 = vsel %vm151_vm3, %v150_v63, %v144_v29  ;;  %v154_v31 = vsel %vm151_vm3, %v144_v29, %v146_v15  ;;  %v130_v32 = vsel %vm126_vm1, %v125_v4, %v119_v28  ;;  %v129_v34 = vsel %vm126_vm1, %v119_v28, %v121_v21 }
  0xe7   :  { %563 = vmatpush.msk.msra.mxu0 %vm102_vm10, %v155_v30  ;;  %571 = vmatpush.msk.msra.mxu1 %vm103_vm2, %v154_v31  ;;  %vm432_vm3 = vcmask 64512   ;;  %vm522_vm1 = vcmask 1043456  }
  0xe9   :  { %564 = vmatpush.msk.msra.mxu0 %vm131_vm0, %v130_v32  ;;  %572 = vmatpush.msk.msra.mxu1 %vm132_vm7, %v129_v34 }
  0xea   :  { %550 = vmatmul.msk.f32.vlgmr.msra.gmra.mxu1 %vm343_vm5, %v306_v11  ;;  %549 = vmatmul.msk.f32.vlgmr.msra.gmra.mxu0 %vm343_vm5, %v306_v11 }
 0x154   :  { %v424_v35 = vpop.f32.mrf.mxu3 }
 0x155   :  { %v430_v37 = vmax.f32 %v424_v35, 0.0 }
 0x157   :  { %511 = vmatpush.msrb.mxu3 %v430_v37 }
 0x158   :  { %556 = vmatmul.msk.f32.vlgmr.msrb.gmra.mxu3 %vm432_vm3, %v431_v38 }
 0x15e   :  { %v404_v33 = vpop.f32.mrf.mxu2 }
 0x15f   :  { %v429_v36 = vmax.f32 %v404_v33, 0.0 }
 0x161   :  { %491 = vmatpush.msrb.mxu2 %v429_v36 }
 0x162   :  { %555 = vmatmul.msk.f32.vlgmr.msrb.gmra.mxu2 %vm432_vm3, %v431_v38 }
 0x167   :  { %v384_v39 = vpop.f32.mrf.mxu1  ;;  %v364_v40 = vpop.f32.mrf.mxu0 }
 0x168   :  { %v428_v16 = vmax.f32 %v384_v39, 0.0  ;;  %v427_v41 = vmax.f32 %v364_v40, 0.0 }
 0x16a   :  { %471 = vmatpush.msrb.mxu1 %v428_v16  ;;  %451 = vmatpush.msrb.mxu0 %v427_v41 }
 0x16b   :  { %554 = vmatmul.msk.f32.vlgmr.msrb.gmra.mxu1 %vm432_vm3, %v431_v38  ;;  %553 = vmatmul.msk.f32.vlgmr.msrb.gmra.mxu0 %vm432_vm3, %v431_v38 }
 0x1db   :  { %v513_v42 = vpop.f32.mrf.mxu3 }
 0x1dc   :  { %v521_v43 = vrot.slane %v513_v42, 4 }
 0x1e5   :  { %v493_v44 = vpop.f32.mrf.mxu2 }
 0x1e6   :  { %v524_v45 = vsel %vm522_vm1, %v493_v44, %v521_v43 }
 0x1e7   :  { %v528_v46 = vadd.f32 %v524_v45, %v746_v1 }
 0x1e8   :  { %v473_v47 = vpop.f32.mrf.mxu1  ;;  %v453_v48 = vpop.f32.mrf.mxu0 }
 0x1e9   :  { %v520_v49 = vrot.slane %v473_v47, 4  ;;  %530 = vst [vmem:[#allocation10 + $0x8] sm:$0xff] %v528_v46 }
 0x1eb   :  { %v523_v50 = vsel %vm522_vm1, %v453_v48, %v520_v49 }
 0x1ec   :  { %v527_v51 = vadd.f32 %v523_v50, %v748_v2 }
 0x1ee   :  { %529 = vst [vmem:[#allocation10] sm:$0xff] %v527_v51 }
 0x1ef   :  { %541 = dma.vmem_to_hbm [thread:$0]  %s537_s6, 256, %s539_s9, [#allocation6]  }
 0x1f0   :  { %702 = dma.done.wait [#allocation6], 256  }
 0x1f1   :  { %703 = vsyncadd [#allocation6], 4294967040 }
 0x1f2   :  { %546 = vsyncpa [#allocation5], 1 }
 0x1f3   :  { %547 = vsyncpa [#allocation8], 1 }
 0x1f4   :  { %548 = vsyncpa [#allocation6], 1 }

</bundles_post_ra>
